<compile_context>
chip_gen: v5e
topology: v5e:2x2
jax: 0.10.0
libtpu: 0.0.40
codegen_flags: <defaults>
</compile_context>

<pallas_src>
import jax
import jax.numpy as jnp
import numpy as np
from jax.experimental import pallas as pl
from jax.experimental.pallas import tpu as pltpu


def _mlp_kernel(x_ref, w1_ref, b1_ref, w2_ref, b2_ref, w3_ref, b3_ref, o_ref):
    # x_ref: (TB, num_inp) block of the untransposed input.  Flip batch onto
    # the lane axis in-kernel (XLU transpose; its slot is otherwise idle) so
    # the PyTorch-layout (out, in) weights contract directly with no wrapper
    # transpose over HBM.
    xt = x_ref[...].T                                            # (num_inp, TB)

    h1 = jnp.dot(w1_ref[...], xt, preferred_element_type=jnp.float32) + b1_ref[...]
    h1 = jnp.maximum(h1, 0.0)                                    # (10, TB)

    h2 = jnp.dot(w2_ref[...], h1, preferred_element_type=jnp.float32) + b2_ref[...]
    h2 = jnp.maximum(h2, 0.0)                                    # (8, TB)

    h3 = jnp.dot(w3_ref[...], h2, preferred_element_type=jnp.float32) + b3_ref[...]  # (3, TB)

    # Softmax over the feature axis (axis 0 here == PyTorch dim=1): a cheap
    # 3-element sublane reduce, lane-dense over the batch.  Exact division so
    # every row sums to exactly 1 (approx reciprocal removed — it cost
    # accuracy for no measurable gain on a (1, TB) vector).
    m = jnp.max(h3, axis=0, keepdims=True)
    e = jnp.exp(h3 - m)
    p = e / jnp.sum(e, axis=0, keepdims=True)

    # Back to (TB, 3) so the HBM output keeps the PyTorch (B, 3) shape.
    o_ref[...] = p.T.astype(o_ref.dtype)


def mlp_forward(x, params, tb=8192):
    """x: (B, num_inp) float32 (PyTorch layout). Returns (B, 3) softmax probs."""
    w1, b1, w2, b2, w3, b3 = params
    B, num_inp = x.shape
    out_dim = w3.shape[0]

    # Batch tile: full B when small, else `tb` rows (multiple of 128 keeps the
    # stores on the unmasked lane-dense path and blocks (8,128)-aligned).
    # When B > tb the grid has >= 2 steps, so both v7x TensorCores get work.
    if B <= tb:
        TB = B
    else:
        assert tb % 128 == 0, "tb must be a multiple of 128"
        TB = tb
    nb = pl.cdiv(B, TB)

    # Biases as (out, 1) columns so they broadcast over the lane (batch) axis.
    b1c = b1.reshape(-1, 1)
    b2c = b2.reshape(-1, 1)
    b3c = b3.reshape(-1, 1)

    return pl.pallas_call(
        _mlp_kernel,
        out_shape=jax.ShapeDtypeStruct((B, out_dim), jnp.float32),
        grid=(nb,),
        in_specs=[
            pl.BlockSpec((TB, num_inp), lambda i: (i, 0)),   # x tile (streamed)
            pl.BlockSpec(w1.shape, lambda i: (0, 0)),        # weights/biases resident
            pl.BlockSpec(b1c.shape, lambda i: (0, 0)),
            pl.BlockSpec(w2.shape, lambda i: (0, 0)),
            pl.BlockSpec(b2c.shape, lambda i: (0, 0)),
            pl.BlockSpec(w3.shape, lambda i: (0, 0)),
            pl.BlockSpec(b3c.shape, lambda i: (0, 0)),
        ],
        out_specs=pl.BlockSpec((TB, out_dim), lambda i: (i, 0)),
        compiler_params=pltpu.CompilerParams(
            dimension_semantics=("parallel",),        # megacore sharding on v7x
            vmem_limit_bytes=48 * 1024 * 1024,        # > scoped defaults, < physical on all gens
        ),
    )(x, w1, b1c, w2, b2c, w3, b3c)


def init_params(num_inp, key):
    """Deterministic init matching the PyTorch module's shapes.
    Weights: xavier-uniform, PyTorch (out, in) layout; biases: small uniform."""
    def xavier(k, fan_out, fan_in):
        limit = np.sqrt(6.0 / (fan_in + fan_out))
        return jax.random.uniform(k, (fan_out, fan_in), jnp.float32, -limit, limit)

    k1, k2, k3, k4, k5, k6 = jax.random.split(key, 6)
    w1 = xavier(k1, 10, num_inp)
    b1 = jax.random.uniform(k4, (10,), jnp.float32, -0.1, 0.1)
    w2 = xavier(k2, 8, 10)
    b2 = jax.random.uniform(k5, (8,), jnp.float32, -0.1, 0.1)
    w3 = xavier(k3, 3, 8)
    b3 = jax.random.uniform(k6, (3,), jnp.float32, -0.1, 0.1)
    return (w1, b1, w2, b2, w3, b3)


def _reference_np(x, params):
    """Host-side float64 reference (avoids any device matmul-precision question)."""
    w1, b1, w2, b2, w3, b3 = (np.asarray(p, dtype=np.float64) for p in params)
    xf = np.asarray(x, dtype=np.float64)
    h = np.maximum(xf @ w1.T + b1, 0.0)
    h = np.maximum(h @ w2.T + b2, 0.0)
    z = h @ w3.T + b3
    z = z - z.max(axis=1, keepdims=True)
    e = np.exp(z)
    return e / e.sum(axis=1, keepdims=True)


if __name__ == "__main__":
    num_inp = 16
    key = jax.random.PRNGKey(0)
    kx, kp, kx2, kx3 = jax.random.split(key, 4)
    params = init_params(num_inp, kp)

    # Small shape consistent with the module: batch=8 rows of num_inp=16 feats.
    x_small = jax.random.normal(kx, (8, num_inp), jnp.float32)
    out_small = jax.block_until_ready(mlp_forward(x_small, params))
    np.testing.assert_allclose(np.asarray(out_small), _reference_np(x_small, params),
                               rtol=1e-4, atol=1e-5)
    # Exact softmax normalization (the approx-reciprocal bug is gone).
    np.testing.assert_allclose(np.asarray(out_small).sum(axis=1), 1.0, rtol=1e-5)

    # Multi-grid-step path (small tb override keeps test shapes small): 3 tiles.
    x_tiled = jax.random.normal(kx2, (384, num_inp), jnp.float32)
    out_tiled = jax.block_until_ready(mlp_forward(x_tiled, params, tb=128))
    np.testing.assert_allclose(np.asarray(out_tiled), _reference_np(x_tiled, params),
                               rtol=1e-4, atol=1e-5)

    # Ragged last block (B=200 with TB=128): padded rows are computed but
    # clipped on store; valid rows must still be exact.
    x_ragged = jax.random.normal(kx3, (200, num_inp), jnp.float32)
    out_ragged = jax.block_until_ready(mlp_forward(x_ragged, params, tb=128))
    np.testing.assert_allclose(np.asarray(out_ragged), _reference_np(x_ragged, params),
                               rtol=1e-4, atol=1e-5)

    print("KERNEL_OK")
</pallas_src>

<mosaic_0001>
module attributes {stable_mosaic.version = 11 : i64} {
  func.func @_mlp_kernel(%arg0: i32, %arg1: memref<8x16xf32, #tpu.memory_space<vmem>>, %arg2: memref<10x16xf32, #tpu.memory_space<vmem>>, %arg3: memref<10x1xf32, #tpu.memory_space<vmem>>, %arg4: memref<8x10xf32, #tpu.memory_space<vmem>>, %arg5: memref<8x1xf32, #tpu.memory_space<vmem>>, %arg6: memref<3x8xf32, #tpu.memory_space<vmem>>, %arg7: memref<3x1xf32, #tpu.memory_space<vmem>>, %arg8: memref<8x3xf32, #tpu.memory_space<vmem>>) attributes {dimension_semantics = [#tpu.dimension_semantics<parallel>], iteration_bounds = array<i64: 1>, scalar_prefetch = 0 : i64, scratch_operands = 0 : i64, tpu.core_type = #tpu.core_type<tc>, window_params = [{transform_indices = @transform_0, window_bounds = array<i64: 8, 16>}, {pipeline_mode = #tpu.pipeline_mode<synchronous>, transform_indices = @transform_1, window_bounds = array<i64: 10, 16>}, {pipeline_mode = #tpu.pipeline_mode<synchronous>, transform_indices = @transform_2, window_bounds = array<i64: 10, 1>}, {pipeline_mode = #tpu.pipeline_mode<synchronous>, transform_indices = @transform_3, window_bounds = array<i64: 8, 10>}, {pipeline_mode = #tpu.pipeline_mode<synchronous>, transform_indices = @transform_4, window_bounds = array<i64: 8, 1>}, {pipeline_mode = #tpu.pipeline_mode<synchronous>, transform_indices = @transform_5, window_bounds = array<i64: 3, 8>}, {pipeline_mode = #tpu.pipeline_mode<synchronous>, transform_indices = @transform_6, window_bounds = array<i64: 3, 1>}, {transform_indices = @transform_7, window_bounds = array<i64: 8, 3>}]} {
    %c0 = arith.constant 0 : index
    %c0_0 = arith.constant 0 : index
    %0 = vector.load %arg1[%c0, %c0_0] : memref<8x16xf32, #tpu.memory_space<vmem>>, vector<8x16xf32>
    %1 = tpu.transpose %0, [1, 0] : vector<8x16xf32> -> vector<16x8xf32>
    %c0_1 = arith.constant 0 : index
    %c0_2 = arith.constant 0 : index
    %2 = vector.load %arg2[%c0_1, %c0_2] : memref<10x16xf32, #tpu.memory_space<vmem>>, vector<10x16xf32>
    %cst = arith.constant dense<0.000000e+00> : vector<10x8xf32>
    %3 = tpu.matmul %2, %1, %cst {dimension_numbers = #tpu.dot_dimension_numbers<[1], [0], [0], [1], [0, 0, 1, 1], [], []>} : vector<10x16xf32>, vector<16x8xf32>, vector<10x8xf32> -> vector<10x8xf32>
    %c0_3 = arith.constant 0 : index
    %c0_4 = arith.constant 0 : index
    %4 = vector.load %arg3[%c0_3, %c0_4] : memref<10x1xf32, #tpu.memory_space<vmem>>, vector<10x1xf32>
    %5 = vector.broadcast %4 : vector<10x1xf32> to vector<10x8xf32>
    %6 = arith.addf %3, %5 : vector<10x8xf32>
    %cst_5 = arith.constant 0.000000e+00 : f32
    %7 = vector.broadcast %cst_5 : f32 to vector<10x8xf32>
    %8 = arith.maximumf %6, %7 : vector<10x8xf32>
    %c0_6 = arith.constant 0 : index
    %c0_7 = arith.constant 0 : index
    %9 = vector.load %arg4[%c0_6, %c0_7] : memref<8x10xf32, #tpu.memory_space<vmem>>, vector<8x10xf32>
    %cst_8 = arith.constant dense<0.000000e+00> : vector<8x8xf32>
    %10 = tpu.matmul %9, %8, %cst_8 {dimension_numbers = #tpu.dot_dimension_numbers<[1], [0], [0], [1], [0, 0, 1, 1], [], []>} : vector<8x10xf32>, vector<10x8xf32>, vector<8x8xf32> -> vector<8x8xf32>
    %c0_9 = arith.constant 0 : index
    %c0_10 = arith.constant 0 : index
    %11 = vector.load %arg5[%c0_9, %c0_10] : memref<8x1xf32, #tpu.memory_space<vmem>>, vector<8x1xf32>
    %12 = vector.broadcast %11 : vector<8x1xf32> to vector<8x8xf32>
    %13 = arith.addf %10, %12 : vector<8x8xf32>
    %cst_11 = arith.constant 0.000000e+00 : f32
    %14 = vector.broadcast %cst_11 : f32 to vector<8x8xf32>
    %15 = arith.maximumf %13, %14 : vector<8x8xf32>
    %c0_12 = arith.constant 0 : index
    %c0_13 = arith.constant 0 : index
    %16 = vector.load %arg6[%c0_12, %c0_13] : memref<3x8xf32, #tpu.memory_space<vmem>>, vector<3x8xf32>
    %cst_14 = arith.constant dense<0.000000e+00> : vector<3x8xf32>
    %17 = tpu.matmul %16, %15, %cst_14 {dimension_numbers = #tpu.dot_dimension_numbers<[1], [0], [0], [1], [0, 0, 1, 1], [], []>} : vector<3x8xf32>, vector<8x8xf32>, vector<3x8xf32> -> vector<3x8xf32>
    %c0_15 = arith.constant 0 : index
    %c0_16 = arith.constant 0 : index
    %18 = vector.load %arg7[%c0_15, %c0_16] : memref<3x1xf32, #tpu.memory_space<vmem>>, vector<3x1xf32>
    %19 = vector.broadcast %18 : vector<3x1xf32> to vector<3x8xf32>
    %20 = arith.addf %17, %19 : vector<3x8xf32>
    %cst_17 = arith.constant dense<0xFF800000> : vector<8xf32>
    %21 = vector.multi_reduction <maximumf>, %20, %cst_17 [0] : vector<3x8xf32> to vector<8xf32>
    %22 = vector.shape_cast %21 : vector<8xf32> to vector<1x8xf32>
    %23 = vector.broadcast %22 : vector<1x8xf32> to vector<3x8xf32>
    %24 = arith.subf %20, %23 : vector<3x8xf32>
    %25 = math.exp %24 : vector<3x8xf32>
    %cst_18 = arith.constant dense<0.000000e+00> : vector<8xf32>
    %26 = vector.multi_reduction <add>, %25, %cst_18 [0] : vector<3x8xf32> to vector<8xf32>
    %27 = vector.shape_cast %26 : vector<8xf32> to vector<1x8xf32>
    %28 = vector.broadcast %27 : vector<1x8xf32> to vector<3x8xf32>
    %29 = arith.divf %25, %28 : vector<3x8xf32>
    %30 = tpu.transpose %29, [1, 0] : vector<3x8xf32> -> vector<8x3xf32>
    %c0_19 = arith.constant 0 : index
    %c0_20 = arith.constant 0 : index
    %31 = vector.load %arg8[%c0_19, %c0_20] : memref<8x3xf32, #tpu.memory_space<vmem>>, vector<8x3xf32>
    tpu.vector_store %arg8[%c0_19, %c0_20], %30 {strides = array<i32>} : memref<8x3xf32, #tpu.memory_space<vmem>>, vector<8x3xf32>,
    return
  }
  func.func @transform_0(%arg0: i32) -> (i32, i32) {
    %c0_i32 = arith.constant 0 : i32
    %c0_i32_0 = arith.constant 0 : i32
    return %arg0, %c0_i32 : i32, i32
  }
  func.func @transform_1(%arg0: i32) -> (i32, i32) {
    %c0_i32 = arith.constant 0 : i32
    %c0_i32_0 = arith.constant 0 : i32
    %c0_i32_1 = arith.constant 0 : i32
    return %c0_i32, %c0_i32_0 : i32, i32
  }
  func.func @transform_2(%arg0: i32) -> (i32, i32) {
    %c0_i32 = arith.constant 0 : i32
    %c0_i32_0 = arith.constant 0 : i32
    %c0_i32_1 = arith.constant 0 : i32
    return %c0_i32, %c0_i32_0 : i32, i32
  }
  func.func @transform_3(%arg0: i32) -> (i32, i32) {
    %c0_i32 = arith.constant 0 : i32
    %c0_i32_0 = arith.constant 0 : i32
    %c0_i32_1 = arith.constant 0 : i32
    return %c0_i32, %c0_i32_0 : i32, i32
  }
  func.func @transform_4(%arg0: i32) -> (i32, i32) {
    %c0_i32 = arith.constant 0 : i32
    %c0_i32_0 = arith.constant 0 : i32
    %c0_i32_1 = arith.constant 0 : i32
    return %c0_i32, %c0_i32_0 : i32, i32
  }
  func.func @transform_5(%arg0: i32) -> (i32, i32) {
    %c0_i32 = arith.constant 0 : i32
    %c0_i32_0 = arith.constant 0 : i32
    %c0_i32_1 = arith.constant 0 : i32
    return %c0_i32, %c0_i32_0 : i32, i32
  }
  func.func @transform_6(%arg0: i32) -> (i32, i32) {
    %c0_i32 = arith.constant 0 : i32
    %c0_i32_0 = arith.constant 0 : i32
    %c0_i32_1 = arith.constant 0 : i32
    return %c0_i32, %c0_i32_0 : i32, i32
  }
  func.func @transform_7(%arg0: i32) -> (i32, i32) {
    %c0_i32 = arith.constant 0 : i32
    %c0_i32_0 = arith.constant 0 : i32
    return %arg0, %c0_i32 : i32, i32
  }
}

</mosaic_0001>

<bundles_post_ra>
// kernel: tpu_custom_call.1
= control target key start
LH: loop header
LB: loop body
LE: loop exit
PB: predicated region body
PF: predicated region fallthrough
CT: control target
= control target key end

     0   :  { %12 = vsyncpa [#allocation3], 0  ;;  %s271_s27 = smov [#allocation2]   ;;  %s343_s0 = inlined_call_operand.vmem [shape: f32[8,16], index: 0, kind: input, shape index: {}]   ;;  %s344_s1 = inlined_call_operand.vmem [shape: f32[10,16], index: 1, kind: input, shape index: {}]   ;;  %s345_s2 = inlined_call_operand.vmem [shape: f32[10,1], index: 2, kind: input, shape index: {}]   ;;  %s346_s3 = inlined_call_operand.hbm [shape: f32[8,10], index: 3, kind: input, shape index: {}]   ;;  %s347_s4 = inlined_call_operand.vmem [shape: f32[8,1], index: 4, kind: input, shape index: {}]   ;;  %s348_s5 = inlined_call_operand.vmem [shape: f32[3,8], index: 5, kind: input, shape index: {}]   ;;  %s349_s6 = inlined_call_operand.vmem [shape: f32[3,1], index: 6, kind: input, shape index: {}]   ;;  %s350_s7 = inlined_call_operand.vmem [shape: f32[8,3], index: 7, kind: output, shape index: {}]  }
   0x1   :  { %s24_s26 = sshll.u32 %s346_s3, 4  ;;  %s26_s28 = sshll.u32 %s271_s27, 4  ;;  %s25_s26 = int_to_ptr.hbm [resolvable:$true] %s24_s26  ;;  %s27_s28 = int_to_ptr.vmem [resolvable:$true] %s26_s28 }
   0x2   :  { %29 = dma.hbm_to_vmem [thread:$0]  %s25_s26, 128, %s27_s28, [#allocation3]  }
   0x3   :  { %269 = dma.done.wait [#allocation3], 128  }
   0x4   :  { %270 = vsyncadd [#allocation3], 4294967168  ;;  %v272_v0 = vmov 0   ;;  %vm55_vm0 = vcmask 130048   ;;  %v40_v1 = vld [vmem:[%s343_s0] sm:$0xff]  ;;  %vm101_vm1 = vcmask 1041408  }
   0x5   :  { %239 = vset.pattern.permute.xlu0 %v272_v0  ;;  %240 = vset.pattern.permute.xlu1 %v272_v0  ;;  %v41_v2 = vld [vmem:[%s344_s1] sm:$0xff]  ;;  %v42_v3 = vld [vmem:[%s344_s1 + $0x8] sm:$0x3]  ;;  %vm97_vm2 = vcmask 80896   ;;  %vm133_vm3 = vcmask 64512   ;;  %vm157_vm4 = vcmask 59392  }
   0x6   :  { %229 = vmatpush.xpose.msk.msra.mxu0 %vm55_vm0, %v40_v1  ;;  %235 = vmatpush.xpose.msk.msra.mxu3 %vm55_vm0, %v40_v1  ;;  %v44_v4 = vld [vmem:[%s345_s2 + $0x8] sm:$0x3]  ;;  %v43_v5 = vld [vmem:[%s345_s2] sm:$0xff]  ;;  %vm222_vm9 = vcmask 23552  }
   0x7   :  { %52 = vperm.xlu0 %239, %v44_v4   ;;  %v91_v6 = vld [vmem:[%s347_s4] sm:$0xff] }
   0x8   :  { %94 = vperm.xlu1 %240, %v91_v6   ;;  %v127_v7 = vld [vmem:[%s349_s6] sm:$0x7] }
   0x9   :  { %230 = vmatmul.msk.f32.vlgmr.msra.gmra.mxu0 %vm55_vm0, %v41_v2  ;;  %231 = vmatmul.msk.f32.vlgmr.msra.gmra.mxu3 %vm55_vm0, %v42_v3  ;;  %v90_v16 = vld [vmem:[#allocation2] sm:$0xff] }
   0xa   :  { %v126_v21 = vld [vmem:[%s348_s5] sm:$0x7] }
   0xf   :  { %47 = vperm.xlu0 %239, %v43_v5  }
  0x10   :  { %130 = vperm.xlu1 %240, %v127_v7  }
  0x79   :  { %v53_v8 = vpop.permute.xlu0 %52 }
  0x7a   :  { %v95_v17 = vpop.permute.xlu1 %94 }
  0x81   :  { %v48_v9 = vpop.permute.xlu0 %47 }
  0x82   :  { %v131_v22 = vpop.permute.xlu1 %130 }
  0x86   :  { %v82_v10 = vpop.f32.mrf.mxu0 }
  0x87   :  { %v83_v12 = vadd.f32 %v82_v10, %v48_v9 }
  0x89   :  { %v88_v15 = vmax.f32 %v83_v12, 0.0 }
  0x8c   :  { %v85_v11 = vpop.f32.mrf.mxu3 }
  0x8d   :  { %v86_v13 = vadd.f32 %v85_v11, %v53_v8 }
  0x8f   :  { %v89_v14 = vmax.f32 %v86_v13, 0.0 }
  0x91   :  { %232 = vmatpush.msk.msra.mxu1 %vm101_vm1, %v89_v14 }
  0x93   :  { %120 = vmatpush.msra.mxu1 %v88_v15 }
  0x94   :  { %233 = vmatmul.msk.f32.vlgmr.msra.gmra.mxu1 %vm97_vm2, %v90_v16 }
 0x111   :  { %v122_v18 = vpop.f32.mrf.mxu1 }
 0x112   :  { %v123_v19 = vadd.f32 %v122_v18, %v95_v17 }
 0x114   :  { %v125_v20 = vmax.f32 %v123_v19, 0.0 }
 0x116   :  { %152 = vmatpush.msra.mxu2 %v125_v20 }
 0x117   :  { %234 = vmatmul.msk.f32.vlgmr.msra.gmra.mxu2 %vm133_vm3, %v126_v21 }
 0x19a   :  { %v154_v23 = vpop.f32.mrf.mxu2 }
 0x19b   :  { %v155_v24 = vadd.f32 %v154_v23, %v131_v22 }
 0x19d   :  { %v158_v25 = vsel %vm157_vm4, %v155_v24, -inf }
 0x19e   :  { %v159_v26 = vrot.slane %v158_v25, 4 }
 0x1a0   :  { %v160_v27 = vmax.f32 %v158_v25, %v159_v26 }
 0x1a2   :  { %v161_v28 = vrot.slane %v160_v27, 2 }
 0x1a4   :  { %v162_v29 = vmax.f32 %v160_v27, %v161_v28 }
 0x1a6   :  { %v163_v30 = vrot.slane %v162_v29, 1 }
 0x1a8   :  { %v164_v31 = vmax.f32 %v162_v29, %v163_v30 }
 0x1aa   :  { %v165_v32 = vsub.f32 %v155_v24, %v164_v31 }
 0x1ac   :  { %v166_v33 = vmul.f32 1.442695, %v165_v32 }
 0x1ae   :  { %241 = vpow2.f32 %v166_v33 }
 0x1b4   :  { %v242_v34 = vpop.eup %241 }
 0x1b5   :  { %v168_v35 = vsel %vm157_vm4, %v242_v34, 0.0 }
 0x1b6   :  { %v169_v36 = vrot.slane %v168_v35, 4 }
 0x1b8   :  { %v170_v37 = vadd.f32 %v169_v36, %v168_v35 }
 0x1ba   :  { %v171_v38 = vrot.slane %v170_v37, 2 }
 0x1bc   :  { %v172_v39 = vadd.f32 %v171_v38, %v170_v37 }
 0x1be   :  { %v173_v40 = vrot.slane %v172_v39, 1 }
 0x1c0   :  { %v174_v41 = vadd.f32 %v173_v40, %v172_v39 }
 0x1c2   :  { %243 = vrcp.f32 %v174_v41  ;;  %v186_v45 = vand.u32 2147483648, %v174_v41  ;;  %v184_v47 = vand.u32 2147483647, %v174_v41  ;;  %vm180_vm6 = vweird.f32 %v174_v41 }
 0x1c4   :  { %v187_v49 = vor.u32 1.1754944e-38, %v186_v45  ;;  %vm185_vm8 = vcmp.eq.f32.partialorder %v184_v47, 8.507059e+37 }
 0x1c8   :  { %v244_v42 = vpop.eup %243 }
 0x1c9   :  { %v176_v43 = vmul.f32 %v244_v42, %v174_v41  ;;  %vm181_vm5 = vweird.f32 %v244_v42 }
 0x1ca   :  { %vm182_vm7 = vmor %vm180_vm6, %vm181_vm5 }
 0x1cb   :  { %v177_v44 = vsub.f32 1.0, %v176_v43 }
 0x1cd   :  { %v178_v46 = vmul.f32 %v244_v42, %v177_v44 }
 0x1cf   :  { %v179_v48 = vadd.f32 %v244_v42, %v178_v46 }
 0x1d1   :  { %v183_v50 = vsel %vm182_vm7, %v244_v42, %v179_v48 }
 0x1d2   :  { %v188_v51 = vsel %vm185_vm8, %v187_v49, %v183_v50 }
 0x1d3   :  { %v189_v52 = vmul.f32 %v242_v34, %v188_v51 }
 0x1d5   :  { %190 = vxpose.xlu2.b32.start.end [1/1] (short) (narrow) %v189_v52, 8 }
 0x26e   :  { %v206_v53 = vpop.trf.xlu2 }
 0x26f   :  { %223 = vst.msk [vmem:[%s350_s7] sm:$0xff] %vm222_vm9, %v206_v53 }
 0x270   :  { %228 = vsyncpa [#allocation3], 1 }

</bundles_post_ra>
